<compile_context>
chip_gen: v7x
topology: tpu7x:2x2x1
jax: 0.10.0
libtpu: 0.0.40
codegen_flags: <defaults>
</compile_context>

<pallas_src>
import math

import jax
import jax.numpy as jnp
from jax.experimental import pallas as pl
from jax.experimental.pallas import tpu as pltpu

L = 20         # sequence length (rows of q/k/v)
DK = 10        # query/key feature dim
DV = 10        # value feature dim
LDV = L * DV   # 200 useful output lanes per batch row
P = 256        # lane-padded output width (multiple of 128)
TB_MAX = 2048  # cap on batch rows per grid step (VMEM-safe on v5e defaults)


def _attn_kernel(x1_ref, tab_ref, o_ref):
    """One grid step = TB batch rows.

    x1_ref: (TB, L)    int32  raw mask-source rows
    tab_ref:(L, 2*P)   f32    fused batch-invariant table:
                              [:, :P] Gt[k, l*DV+d] = E[l,k]*v[k,d] (0-padded)
                              [:, P:] Ee[k, l*DV+d] = E[l,k]        (1-padded)
    o_ref:  (TB, P)    f32    lane-dense, lane-padded output block
    """
    # additive mask m in {0,1}  ->  w = exp(m) in {1, e}, computed in-kernel
    w = jnp.where(x1_ref[...] == 0, jnp.float32(math.e), jnp.float32(1.0))

    # One MXU matmul yields both the unnormalized output and the softmax
    # denominators (pre-broadcast over the DV lanes):
    #   nz[:, :P] = N[b, l*DV+d] = sum_k w[b,k] * E[l,k] * v[k,d]
    #   nz[:, P:] = Z[b, l*DV+d] = sum_k w[b,k] * E[l,k]
    nz = jnp.dot(w, tab_ref[...], preferred_element_type=jnp.float32)
    n = nz[:, :P]
    z = nz[:, P:]

    # exact reciprocal; padded z lanes are >= L > 0 (table one-padding), so no
    # inf / NaN anywhere.
    o_ref[...] = n * pl.reciprocal(z, approx=False)


def _tensorcores_per_chip():
    """2 TensorCores per JAX device on v7x-class chips, else 1."""
    try:
        kind = jax.devices()[0].device_kind.lower()
    except Exception:
        return 1
    return 2 if ("v7" in kind or "7x" in kind) else 1


def _pick_tb(batch):
    cores = _tensorcores_per_chip()
    tb = -(-batch // cores)        # small B: exactly `cores` grid steps
    tb = min(tb, TB_MAX)           # large B: cap block size (VMEM / pipelining)
    tb = ((tb + 7) // 8) * 8       # sublane alignment
    return max(tb, 8)


def attention_forward(query, key, value, x1):
    """query/key: (L, DK), value: (L, DV), x1: (B, L) int.

    Returns (B, 1, L, DV) float32, matching the PyTorch forward semantics.
    """
    B = x1.shape[0]

    # ---- batch-invariant precompute (tiny; hoisted fully out of the kernel) ----
    scale = 1.0 / math.sqrt(DK)
    s = jnp.dot(query, key.T) * scale                # (L, L)
    c = jnp.max(s, axis=-1, keepdims=True)           # rowmax(S) only; mask <= 1
    e = jnp.exp(s - c)                                # E[l, k]        (L, L)
    et = e.T                                          # Et[k, l]       (L, L)
    gt = (et[:, :, None] * value[:, None, :]).reshape(L, LDV)   # (L, 200)
    ee = jnp.repeat(et, DV, axis=1)                              # (L, 200)
    # lane-pad: Gt with zeros (padded N = 0), Ee with ones (padded Z > 0)
    gt_p = jnp.zeros((L, P), jnp.float32).at[:, :LDV].set(gt)
    ee_p = jnp.ones((L, P), jnp.float32).at[:, :LDV].set(ee)
    table = jnp.concatenate([gt_p, ee_p], axis=1)                # (L, 2P)

    # ---- generation-aware batch tiling ----
    TB = _pick_tb(B)
    steps = -(-B // TB)
    b_pad = steps * TB
    x1_i32 = x1.astype(jnp.int32)
    if b_pad != B:
        x1_i32 = jnp.pad(x1_i32, ((0, b_pad - B), (0, 0)))

    grid_spec = pltpu.PrefetchScalarGridSpec(
        num_scalar_prefetch=0,
        grid=(steps,),
        in_specs=[
            pl.BlockSpec((TB, L), lambda i: (i, 0)),        # x1 rows for this step
            pl.BlockSpec((L, 2 * P), lambda i: (0, 0)),     # fused table (same block)
        ],
        out_specs=pl.BlockSpec((TB, P), lambda i: (i, 0)),
    )

    out2d = pl.pallas_call(
        _attn_kernel,
        out_shape=jax.ShapeDtypeStruct((b_pad, P), jnp.float32),
        grid_spec=grid_spec,
        compiler_params=pltpu.CompilerParams(
            dimension_semantics=("parallel",)),
    )(x1_i32, table)

    return out2d[:B, :LDV].reshape(B, 1, L, DV)


def reference_forward(query, key, value, x1):
    """Pure-JAX reference of the same (intended) semantics."""
    qk = (query @ key.T) / math.sqrt(DK)                       # (L, L)
    mask = (x1 == 0).astype(jnp.float32)[:, None, None, :]     # (B,1,1,L)
    mask = jnp.broadcast_to(mask, (x1.shape[0], 1, L, L))      # (B,1,L,L)
    qk = qk[None, None] + mask
    w = jax.nn.softmax(qk, axis=-1)
    return w @ value                                           # (B,1,L,DV)


if __name__ == "__main__":
    root = jax.random.PRNGKey(0)
    kq, kk, kv, kx = jax.random.split(root, 4)

    # deterministic parameter init, uniform(-0.1, 0.1) as in the module
    query = jax.random.uniform(kq, (L, DK), jnp.float32, -0.1, 0.1)
    key_p = jax.random.uniform(kk, (L, DK), jnp.float32, -0.1, 0.1)
    value = jax.random.uniform(kv, (L, DV), jnp.float32, -0.1, 0.1)

    # batched mask source with scattered zeros (exercises tiling + padding)
    B = 200
    x1 = jax.random.randint(kx, (B, L), 0, 5, dtype=jnp.int32)

    out = attention_forward(query, key_p, value, x1)
    out = jax.block_until_ready(out)

    ref = reference_forward(query, key_p, value, x1)
    assert out.shape == (B, 1, L, DV)
    assert jnp.allclose(out, ref, atol=1e-5, rtol=1e-5), \
        float(jnp.max(jnp.abs(out - ref)))

    print("KERNEL_OK")
</pallas_src>

<mosaic_0001>
module attributes {stable_mosaic.version = 11 : i64} {
  func.func @_attn_kernel(%arg0: i32, %arg1: memref<200x20xi32, #tpu.memory_space<vmem>>, %arg2: memref<20x512xf32, #tpu.memory_space<vmem>>, %arg3: memref<200x256xf32, #tpu.memory_space<vmem>>) attributes {dimension_semantics = [#tpu.dimension_semantics<parallel>], iteration_bounds = array<i64: 1>, scalar_prefetch = 0 : i64, scratch_operands = 0 : i64, tpu.core_type = #tpu.core_type<tc>, window_params = [{transform_indices = @transform_0, window_bounds = array<i64: 200, 20>}, {pipeline_mode = #tpu.pipeline_mode<synchronous>, transform_indices = @transform_1, window_bounds = array<i64: 20, 512>}, {transform_indices = @transform_2, window_bounds = array<i64: 200, 256>}]} {
    %c0 = arith.constant 0 : index
    %c0_0 = arith.constant 0 : index
    %0 = vector.load %arg1[%c0, %c0_0] : memref<200x20xi32, #tpu.memory_space<vmem>>, vector<200x20xi32>
    %c0_i32 = arith.constant 0 : i32
    %1 = vector.broadcast %c0_i32 : i32 to vector<200x20xi32>
    %2 = arith.cmpi eq, %0, %1 : vector<200x20xi32>
    %cst = arith.constant 2.71828175 : f32
    %cst_1 = arith.constant 1.000000e+00 : f32
    %3 = vector.broadcast %cst : f32 to vector<200x20xf32>
    %4 = vector.broadcast %cst_1 : f32 to vector<200x20xf32>
    %5 = arith.select %2, %3, %4 : vector<200x20xi1>, vector<200x20xf32>
    %c0_2 = arith.constant 0 : index
    %c0_3 = arith.constant 0 : index
    %6 = vector.load %arg2[%c0_2, %c0_3] : memref<20x512xf32, #tpu.memory_space<vmem>>, vector<20x512xf32>
    %cst_4 = arith.constant dense<0.000000e+00> : vector<200x512xf32>
    %7 = tpu.matmul %5, %6, %cst_4 {dimension_numbers = #tpu.dot_dimension_numbers<[1], [0], [0], [1], [0, 0, 1, 1], [], []>} : vector<200x20xf32>, vector<20x512xf32>, vector<200x512xf32> -> vector<200x512xf32>
    %8 = vector.extract_strided_slice %7 {offsets = [0, 0], sizes = [200, 256], strides = [1, 1]} : vector<200x512xf32> to vector<200x256xf32>
    %9 = vector.extract_strided_slice %7 {offsets = [0, 256], sizes = [200, 256], strides = [1, 1]} : vector<200x512xf32> to vector<200x256xf32>
    %10 = tpu.reciprocal %9 : vector<200x256xf32> -> vector<200x256xf32>
    %11 = arith.mulf %8, %10 : vector<200x256xf32>
    %c0_5 = arith.constant 0 : index
    %c0_6 = arith.constant 0 : index
    %12 = vector.load %arg3[%c0_5, %c0_6] : memref<200x256xf32, #tpu.memory_space<vmem>>, vector<200x256xf32>
    tpu.vector_store %arg3[%c0_5, %c0_6], %11 {strides = array<i32>} : memref<200x256xf32, #tpu.memory_space<vmem>>, vector<200x256xf32>,
    return
  }
  func.func @transform_0(%arg0: i32) -> (i32, i32) {
    %c0_i32 = arith.constant 0 : i32
    %c0_i32_0 = arith.constant 0 : i32
    return %arg0, %c0_i32 : i32, i32
  }
  func.func @transform_1(%arg0: i32) -> (i32, i32) {
    %c0_i32 = arith.constant 0 : i32
    %c0_i32_0 = arith.constant 0 : i32
    %c0_i32_1 = arith.constant 0 : i32
    return %c0_i32, %c0_i32_0 : i32, i32
  }
  func.func @transform_2(%arg0: i32) -> (i32, i32) {
    %c0_i32 = arith.constant 0 : i32
    %c0_i32_0 = arith.constant 0 : i32
    return %arg0, %c0_i32 : i32, i32
  }
}

</mosaic_0001>

<bundles_post_ra>
// kernel: tpu_custom_call.1
= control target key start
LH: loop header
LB: loop body
LE: loop exit
PB: predicated region body
PF: predicated region fallthrough
CT: control target
= control target key end

     0   :  { %v975_v6 = vmov 0.0   ;;  %vm175_vm0 = vcmask 1043456   ;;  %v976_v18 = vmov 1.0   ;;  %vm99_vm2 = vcmask 162816   ;;  %s1247_s0 = inlined_call_operand.vmem [shape: s32[200,20], index: 0, kind: input, shape index: {}]   ;;  %s1248_s1 = inlined_call_operand.vmem [shape: f32[20,512], index: 1, kind: input, shape index: {}]   ;;  %s1249_s2 = inlined_call_operand.hbm [shape: f32[200,256], index: 2, kind: output, shape index: {}]  }
   0x1   :  { %v90_v0 = vld [vmem:[%s1248_s1 + $0x18] sm:$0xff]  ;;  %v89_v2 = vld [vmem:[%s1248_s1 + $0x10] sm:$0xff]  ;;  %467 = vmatprep.mubr.f32.mxu1 %v975_v6  ;;  %252 = vmatprep.mubr.f32.mxu0 %v975_v6  ;;  %v12_v8 = vld [vmem:[%s1247_s0] sm:$0xff] }
   0x2   :  { %v94_v1 = vld [vmem:[%s1248_s1 + $0x38] sm:$0xff]  ;;  %v93_v4 = vld [vmem:[%s1248_s1 + $0x30] sm:$0xff]  ;;  %v88_v9 = vld [vmem:[%s1248_s1 + $0x8] sm:$0xff]  ;;  %vm37_vm1 = vcmp.eq.s32.totalorder %v12_v8, 0 }
   0x3   :  { %v842_v3 = vpack.c.bf16 %v94_v1, %v90_v0  ;;  %v98_v5 = vld [vmem:[%s1248_s1 + $0x58] sm:$0xf]  ;;  %v844_v7 = vpack.c.bf16 %v93_v4, %v89_v2  ;;  %v92_v10 = vld [vmem:[%s1248_s1 + $0x28] sm:$0xff]  ;;  %v87_v12 = vld [vmem:[%s1248_s1] sm:$0xff]  ;;  %v62_v19 = vsel %vm37_vm1, 2.7182817, %v976_v18 }
   0x4   :  { %v838_v11 = vpack.c.bf16 %v92_v10, %v88_v9  ;;  %v91_v13 = vld [vmem:[%s1248_s1 + $0x20] sm:$0xff]  ;;  %v13_v14 = vld [vmem:[%s1247_s0 + $0x8] sm:$0xff]  ;;  %v97_v17 = vld [vmem:[%s1248_s1 + $0x50] sm:$0xf] }
   0x5   :  { %843 = vmatprep.subr.bf16.mxu1 %v842_v3  ;;  %v840_v15 = vpack.c.bf16 %v91_v13, %v87_v12  ;;  %v96_v16 = vld [vmem:[%s1248_s1 + $0x48] sm:$0xf]  ;;  %vm38_vm3 = vcmp.eq.s32.totalorder %v13_v14, 0  ;;  %v95_v20 = vld [vmem:[%s1248_s1 + $0x40] sm:$0xf]  ;;  %v14_v21 = vld [vmem:[%s1247_s0 + $0x10] sm:$0xff] }
   0x6   :  { %845 = vmatpush1.bf16.msra.mxu1 %v844_v7  ;;  %839 = vmatprep.subr.bf16.mxu0 %v838_v11  ;;  %v63_v22 = vsel %vm38_vm3, 2.7182817, %v976_v18  ;;  %vm39_vm4 = vcmp.eq.s32.totalorder %v14_v21, 0  ;;  %v15_v23 = vld [vmem:[%s1247_s0 + $0x18] sm:$0xff]  ;;  %v16_v25 = vld [vmem:[%s1247_s0 + $0x20] sm:$0xff]  ;;  %v17_v27 = vld [vmem:[%s1247_s0 + $0x28] sm:$0xff] }
   0x7   :  { %811 = vmatprep.subr.msk.mxu1 %vm175_vm0, %v98_v5  ;;  %841 = vmatpush1.bf16.msra.mxu0 %v840_v15  ;;  %v64_v24 = vsel %vm39_vm4, 2.7182817, %v976_v18  ;;  %vm40_vm5 = vcmp.eq.s32.totalorder %v15_v23, 0  ;;  %vm41_vm6 = vcmp.eq.s32.totalorder %v16_v25, 0 }
   0x8   :  { %784 = vmatprep.subr.msk.mxu0 %vm175_vm0, %v96_v16  ;;  %v65_v26 = vsel %vm40_vm5, 2.7182817, %v976_v18 }
   0xa   :  { %812 = vmatpush1.msk.msra.mxu1 %vm175_vm0, %v97_v17 }
   0xb   :  { %813 = vmatmul.mubr.msk.f32.vlgmr.msra.gmra.mrb[0].mxu1 %vm99_vm2, %v62_v19  ;;  %785 = vmatpush1.msk.msra.mxu0 %vm175_vm0, %v95_v20 }
   0xc   :  { %473 = vmatprep.mubr.f32.mxu1 %v975_v6  ;;  %786 = vmatmul.mubr.msk.f32.vlgmr.msra.gmra.mrb[0].mxu0 %vm99_vm2, %v62_v19 }
   0xd   :  { %258 = vmatprep.mubr.f32.mxu0 %v975_v6 }
   0xf   :  { %814 = vmatmul.mubr.msk.f32.gmra.mrb[2].mxu1 %vm99_vm2, %v63_v22 }
  0x10   :  { %479 = vmatprep.mubr.f32.mxu1 %v975_v6  ;;  %787 = vmatmul.mubr.msk.f32.gmra.mrb[2].mxu0 %vm99_vm2, %v63_v22 }
  0x11   :  { %264 = vmatprep.mubr.f32.mxu0 %v975_v6 }
  0x13   :  { %815 = vmatmul.mubr.msk.f32.gmra.mrb[4].mxu1 %vm99_vm2, %v64_v24 }
  0x14   :  { %485 = vmatprep.mubr.f32.mxu1 %v975_v6  ;;  %788 = vmatmul.mubr.msk.f32.gmra.mrb[4].mxu0 %vm99_vm2, %v64_v24 }
  0x15   :  { %270 = vmatprep.mubr.f32.mxu0 %v975_v6 }
  0x17   :  { %816 = vmatmul.mubr.msk.f32.gmra.mrb[6].mxu1 %vm99_vm2, %v65_v26 }
  0x18   :  { %7 = vsyncpa [#allocation3], 0  ;;  %491 = vmatprep.mubr.f32.mxu1 %v975_v6  ;;  %v66_v28 = vsel %vm41_vm6, 2.7182817, %v976_v18  ;;  %vm42_vm7 = vcmp.eq.s32.totalorder %v17_v27, 0  ;;  %789 = vmatmul.mubr.msk.f32.gmra.mrb[6].mxu0 %vm99_vm2, %v65_v26  ;;  %v18_v29 = vld [vmem:[%s1247_s0 + $0x30] sm:$0xff] }
  0x19   :  { %276 = vmatprep.mubr.f32.mxu0 %v975_v6  ;;  %v67_v30 = vsel %vm42_vm7, 2.7182817, %v976_v18  ;;  %vm43_vm8 = vcmp.eq.s32.totalorder %v18_v29, 0  ;;  %v19_v31 = vld [vmem:[%s1247_s0 + $0x38] sm:$0xff]  ;;  %v20_v33 = vld [vmem:[%s1247_s0 + $0x40] sm:$0xff]  ;;  %v21_v35 = vld [vmem:[%s1247_s0 + $0x48] sm:$0xff] }
  0x1a   :  { %v68_v32 = vsel %vm43_vm8, 2.7182817, %v976_v18  ;;  %vm44_vm9 = vcmp.eq.s32.totalorder %v19_v31, 0  ;;  %vm45_vm10 = vcmp.eq.s32.totalorder %v20_v33, 0  ;;  %vm46_vm11 = vcmp.eq.s32.totalorder %v21_v35, 0  ;;  %v22_v37 = vld [vmem:[%s1247_s0 + $0x50] sm:$0xff] }
  0x1b   :  { %817 = vmatmul.mubr.msk.f32.gmra.mrb[8].mxu1 %vm99_vm2, %v66_v28  ;;  %v69_v34 = vsel %vm44_vm9, 2.7182817, %v976_v18  ;;  %v70_v36 = vsel %vm45_vm10, 2.7182817, %v976_v18  ;;  %v71_v38 = vsel %vm46_vm11, 2.7182817, %v976_v18 }
  0x1c   :  { %497 = vmatprep.mubr.f32.mxu1 %v975_v6  ;;  %790 = vmatmul.mubr.msk.f32.gmra.mrb[8].mxu0 %vm99_vm2, %v66_v28  ;;  %vm47_vm12 = vcmp.eq.s32.totalorder %v22_v37, 0  ;;  %v23_v39 = vld [vmem:[%s1247_s0 + $0x58] sm:$0xff]  ;;  %v24_v41 = vld [vmem:[%s1247_s0 + $0x60] sm:$0xff]  ;;  %v25_v43 = vld [vmem:[%s1247_s0 + $0x68] sm:$0xff] }
  0x1d   :  { %282 = vmatprep.mubr.f32.mxu0 %v975_v6  ;;  %v72_v40 = vsel %vm47_vm12, 2.7182817, %v976_v18  ;;  %vm48_vm13 = vcmp.eq.s32.totalorder %v23_v39, 0  ;;  %vm49_vm14 = vcmp.eq.s32.totalorder %v24_v41, 0  ;;  %vm50_vm15 = vcmp.eq.s32.totalorder %v25_v43, 0  ;;  %v26_v45 = vld [vmem:[%s1247_s0 + $0x70] sm:$0xff] }
  0x1e   :  { %v73_v42 = vsel %vm48_vm13, 2.7182817, %v976_v18  ;;  %v74_v44 = vsel %vm49_vm14, 2.7182817, %v976_v18  ;;  %v75_v46 = vsel %vm50_vm15, 2.7182817, %v976_v18 }
  0x1f   :  { %818 = vmatmul.mubr.msk.f32.gmra.mrb[10].mxu1 %vm99_vm2, %v67_v30  ;;  %vm51_vm0 = vcmp.eq.s32.totalorder %v26_v45, 0  ;;  %v27_v47 = vld [vmem:[%s1247_s0 + $0x78] sm:$0xff]  ;;  %v28_v49 = vld [vmem:[%s1247_s0 + $0x80] sm:$0xff]  ;;  %v29_v51 = vld [vmem:[%s1247_s0 + $0x88] sm:$0xff] }
  0x20   :  { %503 = vmatprep.mubr.f32.mxu1 %v975_v6  ;;  %791 = vmatmul.mubr.msk.f32.gmra.mrb[10].mxu0 %vm99_vm2, %v67_v30  ;;  %v76_v48 = vsel %vm51_vm0, 2.7182817, %v976_v18  ;;  %vm52_vm1 = vcmp.eq.s32.totalorder %v27_v47, 0  ;;  %vm53_vm3 = vcmp.eq.s32.totalorder %v28_v49, 0  ;;  %vm54_vm4 = vcmp.eq.s32.totalorder %v29_v51, 0  ;;  %v30_v53 = vld [vmem:[%s1247_s0 + $0x90] sm:$0xff] }
  0x21   :  { %288 = vmatprep.mubr.f32.mxu0 %v975_v6  ;;  %v77_v50 = vsel %vm52_vm1, 2.7182817, %v976_v18  ;;  %v78_v52 = vsel %vm53_vm3, 2.7182817, %v976_v18  ;;  %v79_v54 = vsel %vm54_vm4, 2.7182817, %v976_v18 }
  0x22   :  { %vm55_vm5 = vcmp.eq.s32.totalorder %v30_v53, 0  ;;  %v31_v55 = vld [vmem:[%s1247_s0 + $0x98] sm:$0xff]  ;;  %v32_v57 = vld [vmem:[%s1247_s0 + $0xa0] sm:$0xff]  ;;  %v33_v59 = vld [vmem:[%s1247_s0 + $0xa8] sm:$0xff] }
  0x23   :  { %819 = vmatmul.mubr.msk.f32.gmra.mrb[12].mxu1 %vm99_vm2, %v68_v32  ;;  %v80_v56 = vsel %vm55_vm5, 2.7182817, %v976_v18  ;;  %vm56_vm6 = vcmp.eq.s32.totalorder %v31_v55, 0  ;;  %vm57_vm7 = vcmp.eq.s32.totalorder %v32_v57, 0  ;;  %vm58_vm8 = vcmp.eq.s32.totalorder %v33_v59, 0  ;;  %v34_v61 = vld [vmem:[%s1247_s0 + $0xb0] sm:$0xff] }
  0x24   :  { %509 = vmatprep.mubr.f32.mxu1 %v975_v6  ;;  %792 = vmatmul.mubr.msk.f32.gmra.mrb[12].mxu0 %vm99_vm2, %v68_v32  ;;  %v81_v58 = vsel %vm56_vm6, 2.7182817, %v976_v18  ;;  %v82_v60 = vsel %vm57_vm7, 2.7182817, %v976_v18  ;;  %v83_v62 = vsel %vm58_vm8, 2.7182817, %v976_v18 }
  0x25   :  { %294 = vmatprep.mubr.f32.mxu0 %v975_v6  ;;  %vm59_vm9 = vcmp.eq.s32.totalorder %v34_v61, 0  ;;  %v35_v63 = vld [vmem:[%s1247_s0 + $0xb8] sm:$0xff]  ;;  %v36_v1 = vld [vmem:[%s1247_s0 + $0xc0] sm:$0xff]  ;;  %s977_s0 = smov [#allocation2]  }
  0x26   :  { %v84_v0 = vsel %vm59_vm9, 2.7182817, %v976_v18  ;;  %vm60_vm10 = vcmp.eq.s32.totalorder %v35_v63, 0  ;;  %vm61_vm11 = vcmp.eq.s32.totalorder %v36_v1, 0  ;;  %s773_s25 = sshll.u32 %s977_s0, 4  ;;  %s774_s25 = int_to_ptr.vmem [resolvable:$true] %s773_s25 }
  0x27   :  { %820 = vmatmul.mubr.msk.f32.gmra.mrb[14].mxu1 %vm99_vm2, %v69_v34  ;;  %v85_v2 = vsel %vm60_vm10, 2.7182817, %v976_v18  ;;  %v86_v3 = vsel %vm61_vm11, 2.7182817, %v976_v18  ;;  %s951_s26 = scalar_lea.vmem %s774_s25, 6400  ;;  %p956_p1 = scmp.lt.s32.totalorder %s774_s25, %s774_s25 }
  0x28   :  { %515 = vmatprep.mubr.f32.mxu1 %v975_v6  ;;  %793 = vmatmul.mubr.msk.f32.gmra.mrb[14].mxu0 %vm99_vm2, %v69_v34  ;;  %p952_p0 = scmp.ne.s32.totalorder %s774_s25, %s951_s26  ;;  %p957_p2 = scmp.lt.s32.totalorder %s951_s26, %s951_s26 }
  0x29   :  { %300 = vmatprep.mubr.f32.mxu0 %v975_v6 }
  0x2a   :  { %p958_p3 = por %p957_p2, %p956_p1 }
  0x2b   :  { %821 = vmatmul.mubr.msk.f32.gmra.mrb[16].mxu1 %vm99_vm2, %v70_v36 }
  0x2c   :  { %521 = vmatprep.mubr.f32.mxu1 %v975_v6  ;;  %794 = vmatmul.mubr.msk.f32.gmra.mrb[16].mxu0 %vm99_vm2, %v70_v36  ;;  %p959_p4 = pnand %p958_p3, %p952_p0 }
  0x2d   :  { %306 = vmatprep.mubr.f32.mxu0 %v975_v6 }
  0x2f   :  { %822 = vmatmul.mubr.msk.f32.gmra.mrb[18].mxu1 %vm99_vm2, %v71_v38 }
  0x30   :  { %527 = vmatprep.mubr.f32.mxu1 %v975_v6  ;;  %795 = vmatmul.mubr.msk.f32.gmra.mrb[18].mxu0 %vm99_vm2, %v71_v38 }
  0x31   :  { %312 = vmatprep.mubr.f32.mxu0 %v975_v6 }
  0x33   :  { %823 = vmatmul.mubr.msk.f32.gmra.mrb[20].mxu1 %vm99_vm2, %v72_v40 }
  0x34   :  { %533 = vmatprep.mubr.f32.mxu1 %v975_v6  ;;  %796 = vmatmul.mubr.msk.f32.gmra.mrb[20].mxu0 %vm99_vm2, %v72_v40 }
  0x35   :  { %318 = vmatprep.mubr.f32.mxu0 %v975_v6 }
  0x37   :  { %824 = vmatmul.mubr.msk.f32.gmra.mrb[22].mxu1 %vm99_vm2, %v73_v42 }
  0x38   :  { %539 = vmatprep.mubr.f32.mxu1 %v975_v6  ;;  %797 = vmatmul.mubr.msk.f32.gmra.mrb[22].mxu0 %vm99_vm2, %v73_v42 }
  0x39   :  { %324 = vmatprep.mubr.f32.mxu0 %v975_v6 }
  0x3b   :  { %825 = vmatmul.mubr.msk.f32.gmra.mrb[24].mxu1 %vm99_vm2, %v74_v44 }
  0x3c   :  { %545 = vmatprep.mubr.f32.mxu1 %v975_v6  ;;  %798 = vmatmul.mubr.msk.f32.gmra.mrb[24].mxu0 %vm99_vm2, %v74_v44 }
  0x3d   :  { %330 = vmatprep.mubr.f32.mxu0 %v975_v6 }
  0x3f   :  { %826 = vmatmul.mubr.msk.f32.gmra.mrb[26].mxu1 %vm99_vm2, %v75_v46 }
  0x40   :  { %551 = vmatprep.mubr.f32.mxu1 %v975_v6  ;;  %799 = vmatmul.mubr.msk.f32.gmra.mrb[26].mxu0 %vm99_vm2, %v75_v46 }
  0x41   :  { %336 = vmatprep.mubr.f32.mxu0 %v975_v6 }
  0x43   :  { %827 = vmatmul.mubr.msk.f32.gmra.mrb[28].mxu1 %vm99_vm2, %v76_v48 }
  0x44   :  { %557 = vmatprep.mubr.f32.mxu1 %v975_v6  ;;  %800 = vmatmul.mubr.msk.f32.gmra.mrb[28].mxu0 %vm99_vm2, %v76_v48 }
  0x45   :  { %342 = vmatprep.mubr.f32.mxu0 %v975_v6 }
  0x47   :  { %828 = vmatmul.mubr.msk.f32.gmra.mrb[30].mxu1 %vm99_vm2, %v77_v50 }
  0x48   :  { %563 = vmatprep.mubr.f32.mxu1 %v975_v6  ;;  %801 = vmatmul.mubr.msk.f32.gmra.mrb[30].mxu0 %vm99_vm2, %v77_v50 }
  0x49   :  { %348 = vmatprep.mubr.f32.mxu0 %v975_v6 }
  0x4b   :  { %829 = vmatmul.mubr.msk.f32.gmra.mrb[32].mxu1 %vm99_vm2, %v78_v52 }
  0x4c   :  { %569 = vmatprep.mubr.f32.mxu1 %v975_v6  ;;  %802 = vmatmul.mubr.msk.f32.gmra.mrb[32].mxu0 %vm99_vm2, %v78_v52 }
  0x4d   :  { %354 = vmatprep.mubr.f32.mxu0 %v975_v6 }
  0x4f   :  { %830 = vmatmul.mubr.msk.f32.gmra.mrb[34].mxu1 %vm99_vm2, %v79_v54 }
  0x50   :  { %575 = vmatprep.mubr.f32.mxu1 %v975_v6  ;;  %803 = vmatmul.mubr.msk.f32.gmra.mrb[34].mxu0 %vm99_vm2, %v79_v54 }
  0x51   :  { %360 = vmatprep.mubr.f32.mxu0 %v975_v6 }
  0x53   :  { %831 = vmatmul.mubr.msk.f32.gmra.mrb[36].mxu1 %vm99_vm2, %v80_v56 }
  0x54   :  { %581 = vmatprep.mubr.f32.mxu1 %v975_v6  ;;  %804 = vmatmul.mubr.msk.f32.gmra.mrb[36].mxu0 %vm99_vm2, %v80_v56 }
  0x55   :  { %366 = vmatprep.mubr.f32.mxu0 %v975_v6 }
  0x57   :  { %832 = vmatmul.mubr.msk.f32.gmra.mrb[38].mxu1 %vm99_vm2, %v81_v58 }
  0x58   :  { %587 = vmatprep.mubr.f32.mxu1 %v975_v6  ;;  %805 = vmatmul.mubr.msk.f32.gmra.mrb[38].mxu0 %vm99_vm2, %v81_v58 }
  0x59   :  { %372 = vmatprep.mubr.f32.mxu0 %v975_v6 }
  0x5b   :  { %833 = vmatmul.mubr.msk.f32.gmra.mrb[40].mxu1 %vm99_vm2, %v82_v60 }
  0x5c   :  { %593 = vmatprep.mubr.f32.mxu1 %v975_v6  ;;  %806 = vmatmul.mubr.msk.f32.gmra.mrb[40].mxu0 %vm99_vm2, %v82_v60 }
  0x5d   :  { %378 = vmatprep.mubr.f32.mxu0 %v975_v6 }
  0x5f   :  { %834 = vmatmul.mubr.msk.f32.gmra.mrb[42].mxu1 %vm99_vm2, %v83_v62 }
  0x60   :  { %599 = vmatprep.mubr.f32.mxu1 %v975_v6  ;;  %807 = vmatmul.mubr.msk.f32.gmra.mrb[42].mxu0 %vm99_vm2, %v83_v62 }
  0x61   :  { %384 = vmatprep.mubr.f32.mxu0 %v975_v6 }
  0x63   :  { %835 = vmatmul.mubr.msk.f32.gmra.mrb[44].mxu1 %vm99_vm2, %v84_v0 }
  0x64   :  { %605 = vmatprep.mubr.f32.mxu1 %v975_v6  ;;  %808 = vmatmul.mubr.msk.f32.gmra.mrb[44].mxu0 %vm99_vm2, %v84_v0 }
  0x65   :  { %390 = vmatprep.mubr.f32.mxu0 %v975_v6 }
  0x67   :  { %836 = vmatmul.mubr.msk.f32.gmra.mrb[46].mxu1 %vm99_vm2, %v85_v2 }
  0x68   :  { %611 = vmatprep.mubr.f32.mxu1 %v975_v6  ;;  %809 = vmatmul.mubr.msk.f32.gmra.mrb[46].mxu0 %vm99_vm2, %v85_v2 }
  0x69   :  { %396 = vmatprep.mubr.f32.mxu0 %v975_v6 }
  0x6b   :  { %837 = vmatmul.mubr.msk.f32.gmra.mrb[48].mxu1 %vm99_vm2, %v86_v3 }
  0x6c   :  { %810 = vmatmul.mubr.msk.f32.gmra.mrb[48].mxu0 %vm99_vm2, %v86_v3 }
  0xde   :  { %v469_v4 = vpop.f32.mrb[0].mxu1 }
  0xdf   :  { %851 = vrcp.f32 %v469_v4  ;;  %v471_v5 = vpop.f32.mrb[1].mxu1  ;;  %v254_v7 = vpop.f32.mrb[0].mxu0 }
  0xe0   :  { %853 = vrcp.f32 %v471_v5  ;;  %v256_v8 = vpop.f32.mrb[1].mxu0 }
  0xe2   :  { %v475_v9 = vpop.f32.mrb[2].mxu1 }
  0xe3   :  { %855 = vrcp.f32 %v475_v9  ;;  %v477_v10 = vpop.f32.mrb[3].mxu1  ;;  %v260_v11 = vpop.f32.mrb[2].mxu0 }
  0xe4   :  { %857 = vrcp.f32 %v477_v10  ;;  %v262_v12 = vpop.f32.mrb[3].mxu0 }
  0xe6   :  { %v481_v13 = vpop.f32.mrb[4].mxu1 }
  0xe7   :  { %859 = vrcp.f32 %v481_v13  ;;  %v483_v14 = vpop.f32.mrb[5].mxu1  ;;  %v266_v6 = vpop.f32.mrb[4].mxu0 }
  0xe8   :  { %861 = vrcp.f32 %v483_v14  ;;  %v268_v16 = vpop.f32.mrb[5].mxu0 }
  0xe9   :  { %v852_v15 = vpop.eup %851 }
  0xea   :  { %v854_v17 = vpop.eup %853  ;;  %v668_v18 = vmul.f32 %v852_v15, %v254_v7  ;;  %v487_v19 = vpop.f32.mrb[6].mxu1 }
  0xeb   :  { %v669_v20 = vmul.f32 %v854_v17, %v256_v8  ;;  %863 = vrcp.f32 %v487_v19  ;;  %v489_v21 = vpop.f32.mrb[7].mxu1  ;;  %v272_v22 = vpop.f32.mrb[6].mxu0 }
  0xec   :  { %718 = vst [vmem:[#allocation2] sm:$0xff] %v668_v18  ;;  %865 = vrcp.f32 %v489_v21  ;;  %v274_v24 = vpop.f32.mrb[7].mxu0 }
  0xed   :  { %v856_v23 = vpop.eup %855  ;;  %719 = vst [vmem:[#allocation2 + $0x8] sm:$0xff] %v669_v20 }
  0xee   :  { %v858_v25 = vpop.eup %857  ;;  %v670_v26 = vmul.f32 %v856_v23, %v260_v11  ;;  %v493_v27 = vpop.f32.mrb[8].mxu1 }
  0xef   :  { %v671_v28 = vmul.f32 %v858_v25, %v262_v12  ;;  %867 = vrcp.f32 %v493_v27  ;;  %v495_v29 = vpop.f32.mrb[9].mxu1  ;;  %v278_v30 = vpop.f32.mrb[8].mxu0 }
  0xf0   :  { %720 = vst [vmem:[#allocation2 + $0x10] sm:$0xff] %v670_v26  ;;  %869 = vrcp.f32 %v495_v29  ;;  %v280_v32 = vpop.f32.mrb[9].mxu0 }
  0xf1   :  { %v860_v31 = vpop.eup %859  ;;  %721 = vst [vmem:[#allocation2 + $0x18] sm:$0xff] %v671_v28 }
  0xf2   :  { %v862_v33 = vpop.eup %861  ;;  %v672_v34 = vmul.f32 %v860_v31, %v266_v6  ;;  %v499_v35 = vpop.f32.mrb[10].mxu1 }
  0xf3   :  { %v673_v36 = vmul.f32 %v862_v33, %v268_v16  ;;  %871 = vrcp.f32 %v499_v35  ;;  %v501_v37 = vpop.f32.mrb[11].mxu1  ;;  %v284_v38 = vpop.f32.mrb[10].mxu0 }
  0xf4   :  { %722 = vst [vmem:[#allocation2 + $0x20] sm:$0xff] %v672_v34  ;;  %873 = vrcp.f32 %v501_v37  ;;  %v286_v40 = vpop.f32.mrb[11].mxu0 }
  0xf5   :  { %v864_v39 = vpop.eup %863  ;;  %723 = vst [vmem:[#allocation2 + $0x28] sm:$0xff] %v673_v36 }
  0xf6   :  { %v866_v41 = vpop.eup %865  ;;  %v674_v42 = vmul.f32 %v864_v39, %v272_v22  ;;  %v505_v43 = vpop.f32.mrb[12].mxu1 }
  0xf7   :  { %v675_v44 = vmul.f32 %v866_v41, %v274_v24  ;;  %875 = vrcp.f32 %v505_v43  ;;  %v507_v45 = vpop.f32.mrb[13].mxu1  ;;  %v290_v46 = vpop.f32.mrb[12].mxu0 }
  0xf8   :  { %724 = vst [vmem:[#allocation2 + $0x30] sm:$0xff] %v674_v42  ;;  %877 = vrcp.f32 %v507_v45  ;;  %v292_v48 = vpop.f32.mrb[13].mxu0 }
  0xf9   :  { %v868_v47 = vpop.eup %867  ;;  %725 = vst [vmem:[#allocation2 + $0x38] sm:$0xff] %v675_v44 }
  0xfa   :  { %v870_v49 = vpop.eup %869  ;;  %v676_v50 = vmul.f32 %v868_v47, %v278_v30  ;;  %v511_v51 = vpop.f32.mrb[14].mxu1 }
  0xfb   :  { %v677_v52 = vmul.f32 %v870_v49, %v280_v32  ;;  %879 = vrcp.f32 %v511_v51  ;;  %v513_v53 = vpop.f32.mrb[15].mxu1  ;;  %v296_v54 = vpop.f32.mrb[14].mxu0 }
  0xfc   :  { %726 = vst [vmem:[#allocation2 + $0x40] sm:$0xff] %v676_v50  ;;  %881 = vrcp.f32 %v513_v53  ;;  %v298_v56 = vpop.f32.mrb[15].mxu0 }
  0xfd   :  { %v872_v55 = vpop.eup %871  ;;  %727 = vst [vmem:[#allocation2 + $0x48] sm:$0xff] %v677_v52 }
  0xfe   :  { %v874_v57 = vpop.eup %873  ;;  %v678_v58 = vmul.f32 %v872_v55, %v284_v38  ;;  %v517_v59 = vpop.f32.mrb[16].mxu1 }
  0xff   :  { %v679_v60 = vmul.f32 %v874_v57, %v286_v40  ;;  %883 = vrcp.f32 %v517_v59  ;;  %v519_v61 = vpop.f32.mrb[17].mxu1  ;;  %v302_v62 = vpop.f32.mrb[16].mxu0 }
 0x100   :  { %728 = vst [vmem:[#allocation2 + $0x50] sm:$0xff] %v678_v58  ;;  %885 = vrcp.f32 %v519_v61  ;;  %v304_v0 = vpop.f32.mrb[17].mxu0 }
 0x101   :  { %v876_v63 = vpop.eup %875  ;;  %729 = vst [vmem:[#allocation2 + $0x58] sm:$0xff] %v679_v60 }
 0x102   :  { %v878_v1 = vpop.eup %877  ;;  %v680_v2 = vmul.f32 %v876_v63, %v290_v46  ;;  %v523_v3 = vpop.f32.mrb[18].mxu1 }
 0x103   :  { %v681_v4 = vmul.f32 %v878_v1, %v292_v48  ;;  %887 = vrcp.f32 %v523_v3  ;;  %v525_v5 = vpop.f32.mrb[19].mxu1  ;;  %v308_v7 = vpop.f32.mrb[18].mxu0 }
 0x104   :  { %730 = vst [vmem:[#allocation2 + $0x60] sm:$0xff] %v680_v2  ;;  %889 = vrcp.f32 %v525_v5  ;;  %v310_v9 = vpop.f32.mrb[19].mxu0 }
 0x105   :  { %v880_v8 = vpop.eup %879  ;;  %731 = vst [vmem:[#allocation2 + $0x68] sm:$0xff] %v681_v4 }
 0x106   :  { %v882_v10 = vpop.eup %881  ;;  %v682_v11 = vmul.f32 %v880_v8, %v296_v54  ;;  %v529_v12 = vpop.f32.mrb[20].mxu1 }
 0x107   :  { %v683_v13 = vmul.f32 %v882_v10, %v298_v56  ;;  %891 = vrcp.f32 %v529_v12  ;;  %v531_v14 = vpop.f32.mrb[21].mxu1  ;;  %v314_v6 = vpop.f32.mrb[20].mxu0 }
 0x108   :  { %732 = vst [vmem:[#allocation2 + $0x70] sm:$0xff] %v682_v11  ;;  %893 = vrcp.f32 %v531_v14  ;;  %v316_v16 = vpop.f32.mrb[21].mxu0 }
 0x109   :  { %v884_v15 = vpop.eup %883  ;;  %733 = vst [vmem:[#allocation2 + $0x78] sm:$0xff] %v683_v13 }
 0x10a   :  { %v886_v17 = vpop.eup %885  ;;  %v684_v18 = vmul.f32 %v884_v15, %v302_v62  ;;  %v535_v19 = vpop.f32.mrb[22].mxu1 }
 0x10b   :  { %v685_v20 = vmul.f32 %v886_v17, %v304_v0  ;;  %895 = vrcp.f32 %v535_v19  ;;  %v537_v21 = vpop.f32.mrb[23].mxu1  ;;  %v320_v22 = vpop.f32.mrb[22].mxu0 }
 0x10c   :  { %734 = vst [vmem:[#allocation2 + $0x80] sm:$0xff] %v684_v18  ;;  %897 = vrcp.f32 %v537_v21  ;;  %v322_v24 = vpop.f32.mrb[23].mxu0 }
 0x10d   :  { %v888_v23 = vpop.eup %887  ;;  %735 = vst [vmem:[#allocation2 + $0x88] sm:$0xff] %v685_v20 }
 0x10e   :  { %v890_v25 = vpop.eup %889  ;;  %v686_v26 = vmul.f32 %v888_v23, %v308_v7  ;;  %v541_v27 = vpop.f32.mrb[24].mxu1 }
 0x10f   :  { %v687_v28 = vmul.f32 %v890_v25, %v310_v9  ;;  %899 = vrcp.f32 %v541_v27  ;;  %v543_v29 = vpop.f32.mrb[25].mxu1  ;;  %v326_v30 = vpop.f32.mrb[24].mxu0 }
 0x110   :  { %736 = vst [vmem:[#allocation2 + $0x90] sm:$0xff] %v686_v26  ;;  %901 = vrcp.f32 %v543_v29  ;;  %v328_v32 = vpop.f32.mrb[25].mxu0 }
 0x111   :  { %v892_v31 = vpop.eup %891  ;;  %737 = vst [vmem:[#allocation2 + $0x98] sm:$0xff] %v687_v28 }
 0x112   :  { %v894_v33 = vpop.eup %893  ;;  %v688_v34 = vmul.f32 %v892_v31, %v314_v6  ;;  %v547_v35 = vpop.f32.mrb[26].mxu1 }
 0x113   :  { %v689_v36 = vmul.f32 %v894_v33, %v316_v16  ;;  %903 = vrcp.f32 %v547_v35  ;;  %v549_v37 = vpop.f32.mrb[27].mxu1  ;;  %v332_v38 = vpop.f32.mrb[26].mxu0 }
 0x114   :  { %738 = vst [vmem:[#allocation2 + $0xa0] sm:$0xff] %v688_v34  ;;  %905 = vrcp.f32 %v549_v37  ;;  %v334_v40 = vpop.f32.mrb[27].mxu0 }
 0x115   :  { %v896_v39 = vpop.eup %895  ;;  %739 = vst [vmem:[#allocation2 + $0xa8] sm:$0xff] %v689_v36 }
 0x116   :  { %v898_v41 = vpop.eup %897  ;;  %v690_v42 = vmul.f32 %v896_v39, %v320_v22  ;;  %v553_v43 = vpop.f32.mrb[28].mxu1 }
 0x117   :  { %v691_v44 = vmul.f32 %v898_v41, %v322_v24  ;;  %907 = vrcp.f32 %v553_v43  ;;  %v555_v45 = vpop.f32.mrb[29].mxu1  ;;  %v338_v46 = vpop.f32.mrb[28].mxu0 }
 0x118   :  { %740 = vst [vmem:[#allocation2 + $0xb0] sm:$0xff] %v690_v42  ;;  %909 = vrcp.f32 %v555_v45  ;;  %v340_v48 = vpop.f32.mrb[29].mxu0 }
 0x119   :  { %v900_v47 = vpop.eup %899  ;;  %741 = vst [vmem:[#allocation2 + $0xb8] sm:$0xff] %v691_v44 }
 0x11a   :  { %v902_v49 = vpop.eup %901  ;;  %v692_v50 = vmul.f32 %v900_v47, %v326_v30  ;;  %v559_v51 = vpop.f32.mrb[30].mxu1 }
 0x11b   :  { %v693_v52 = vmul.f32 %v902_v49, %v328_v32  ;;  %911 = vrcp.f32 %v559_v51  ;;  %v561_v53 = vpop.f32.mrb[31].mxu1  ;;  %v344_v54 = vpop.f32.mrb[30].mxu0 }
 0x11c   :  { %742 = vst [vmem:[#allocation2 + $0xc0] sm:$0xff] %v692_v50  ;;  %913 = vrcp.f32 %v561_v53  ;;  %v346_v56 = vpop.f32.mrb[31].mxu0 }
 0x11d   :  { %v904_v55 = vpop.eup %903  ;;  %743 = vst [vmem:[#allocation2 + $0xc8] sm:$0xff] %v693_v52 }
 0x11e   :  { %v906_v57 = vpop.eup %905  ;;  %v694_v58 = vmul.f32 %v904_v55, %v332_v38  ;;  %v565_v59 = vpop.f32.mrb[32].mxu1 }
 0x11f   :  { %v695_v60 = vmul.f32 %v906_v57, %v334_v40  ;;  %915 = vrcp.f32 %v565_v59  ;;  %v567_v61 = vpop.f32.mrb[33].mxu1  ;;  %v350_v62 = vpop.f32.mrb[32].mxu0 }
 0x120   :  { %744 = vst [vmem:[#allocation2 + $0xd0] sm:$0xff] %v694_v58  ;;  %917 = vrcp.f32 %v567_v61  ;;  %v352_v0 = vpop.f32.mrb[33].mxu0 }
 0x121   :  { %v908_v63 = vpop.eup %907  ;;  %745 = vst [vmem:[#allocation2 + $0xd8] sm:$0xff] %v695_v60 }
 0x122   :  { %v910_v1 = vpop.eup %909  ;;  %v696_v2 = vmul.f32 %v908_v63, %v338_v46  ;;  %v571_v3 = vpop.f32.mrb[34].mxu1 }
 0x123   :  { %v697_v4 = vmul.f32 %v910_v1, %v340_v48  ;;  %919 = vrcp.f32 %v571_v3  ;;  %v573_v5 = vpop.f32.mrb[35].mxu1  ;;  %v356_v7 = vpop.f32.mrb[34].mxu0 }
 0x124   :  { %746 = vst [vmem:[#allocation2 + $0xe0] sm:$0xff] %v696_v2  ;;  %921 = vrcp.f32 %v573_v5  ;;  %v358_v9 = vpop.f32.mrb[35].mxu0 }
 0x125   :  { %v912_v8 = vpop.eup %911  ;;  %747 = vst [vmem:[#allocation2 + $0xe8] sm:$0xff] %v697_v4 }
 0x126   :  { %v914_v10 = vpop.eup %913  ;;  %v698_v11 = vmul.f32 %v912_v8, %v344_v54  ;;  %v577_v12 = vpop.f32.mrb[36].mxu1 }
 0x127   :  { %v699_v13 = vmul.f32 %v914_v10, %v346_v56  ;;  %923 = vrcp.f32 %v577_v12  ;;  %v579_v14 = vpop.f32.mrb[37].mxu1  ;;  %v362_v6 = vpop.f32.mrb[36].mxu0 }
 0x128   :  { %748 = vst [vmem:[#allocation2 + $0xf0] sm:$0xff] %v698_v11  ;;  %925 = vrcp.f32 %v579_v14  ;;  %v364_v16 = vpop.f32.mrb[37].mxu0 }
 0x129   :  { %v916_v15 = vpop.eup %915  ;;  %749 = vst [vmem:[#allocation2 + $0xf8] sm:$0xff] %v699_v13 }
 0x12a   :  { %v918_v17 = vpop.eup %917  ;;  %v700_v18 = vmul.f32 %v916_v15, %v350_v62  ;;  %v583_v19 = vpop.f32.mrb[38].mxu1 }
 0x12b   :  { %v701_v20 = vmul.f32 %v918_v17, %v352_v0  ;;  %927 = vrcp.f32 %v583_v19  ;;  %v585_v21 = vpop.f32.mrb[39].mxu1  ;;  %v368_v22 = vpop.f32.mrb[38].mxu0 }
 0x12c   :  { %750 = vst [vmem:[#allocation2 + $0x100] sm:$0xff] %v700_v18  ;;  %929 = vrcp.f32 %v585_v21  ;;  %v370_v24 = vpop.f32.mrb[39].mxu0 }
 0x12d   :  { %v920_v23 = vpop.eup %919  ;;  %751 = vst [vmem:[#allocation2 + $0x108] sm:$0xff] %v701_v20 }
 0x12e   :  { %v922_v25 = vpop.eup %921  ;;  %v702_v26 = vmul.f32 %v920_v23, %v356_v7  ;;  %v589_v27 = vpop.f32.mrb[40].mxu1 }
 0x12f   :  { %v703_v28 = vmul.f32 %v922_v25, %v358_v9  ;;  %931 = vrcp.f32 %v589_v27  ;;  %v591_v29 = vpop.f32.mrb[41].mxu1  ;;  %v374_v30 = vpop.f32.mrb[40].mxu0 }
 0x130   :  { %752 = vst [vmem:[#allocation2 + $0x110] sm:$0xff] %v702_v26  ;;  %933 = vrcp.f32 %v591_v29  ;;  %v376_v32 = vpop.f32.mrb[41].mxu0 }
 0x131   :  { %v924_v31 = vpop.eup %923  ;;  %753 = vst [vmem:[#allocation2 + $0x118] sm:$0xff] %v703_v28 }
 0x132   :  { %v926_v33 = vpop.eup %925  ;;  %v704_v34 = vmul.f32 %v924_v31, %v362_v6  ;;  %v595_v35 = vpop.f32.mrb[42].mxu1 }
 0x133   :  { %v705_v36 = vmul.f32 %v926_v33, %v364_v16  ;;  %935 = vrcp.f32 %v595_v35  ;;  %v597_v37 = vpop.f32.mrb[43].mxu1  ;;  %v380_v38 = vpop.f32.mrb[42].mxu0 }
 0x134   :  { %754 = vst [vmem:[#allocation2 + $0x120] sm:$0xff] %v704_v34  ;;  %937 = vrcp.f32 %v597_v37  ;;  %v382_v40 = vpop.f32.mrb[43].mxu0 }
 0x135   :  { %v928_v39 = vpop.eup %927  ;;  %755 = vst [vmem:[#allocation2 + $0x128] sm:$0xff] %v705_v36 }
 0x136   :  { %v930_v41 = vpop.eup %929  ;;  %v706_v42 = vmul.f32 %v928_v39, %v368_v22  ;;  %v601_v43 = vpop.f32.mrb[44].mxu1 }
 0x137   :  { %v707_v44 = vmul.f32 %v930_v41, %v370_v24  ;;  %939 = vrcp.f32 %v601_v43  ;;  %v603_v45 = vpop.f32.mrb[45].mxu1  ;;  %v386_v46 = vpop.f32.mrb[44].mxu0 }
 0x138   :  { %756 = vst [vmem:[#allocation2 + $0x130] sm:$0xff] %v706_v42  ;;  %941 = vrcp.f32 %v603_v45  ;;  %v388_v48 = vpop.f32.mrb[45].mxu0 }
 0x139   :  { %v932_v47 = vpop.eup %931  ;;  %757 = vst [vmem:[#allocation2 + $0x138] sm:$0xff] %v707_v44 }
 0x13a   :  { %v934_v49 = vpop.eup %933  ;;  %v708_v50 = vmul.f32 %v932_v47, %v374_v30  ;;  %v607_v51 = vpop.f32.mrb[46].mxu1 }
 0x13b   :  { %v709_v52 = vmul.f32 %v934_v49, %v376_v32  ;;  %943 = vrcp.f32 %v607_v51  ;;  %v609_v53 = vpop.f32.mrb[47].mxu1  ;;  %v392_v54 = vpop.f32.mrb[46].mxu0 }
 0x13c   :  { %758 = vst [vmem:[#allocation2 + $0x140] sm:$0xff] %v708_v50  ;;  %945 = vrcp.f32 %v609_v53  ;;  %v394_v56 = vpop.f32.mrb[47].mxu0 }
 0x13d   :  { %v936_v55 = vpop.eup %935  ;;  %759 = vst [vmem:[#allocation2 + $0x148] sm:$0xff] %v709_v52 }
 0x13e   :  { %v938_v57 = vpop.eup %937  ;;  %v710_v58 = vmul.f32 %v936_v55, %v380_v38  ;;  %v613_v59 = vpop.f32.mrb[48].mxu1 }
 0x13f   :  { %v711_v60 = vmul.f32 %v938_v57, %v382_v40  ;;  %947 = vrcp.f32 %v613_v59  ;;  %v615_v61 = vpop.f32.mrb[49].mxu1  ;;  %v398_v62 = vpop.f32.mrb[48].mxu0 }
 0x140   :  { %760 = vst [vmem:[#allocation2 + $0x150] sm:$0xff] %v710_v58  ;;  %949 = vrcp.f32 %v615_v61  ;;  %v400_v0 = vpop.f32.mrb[49].mxu0 }
 0x141   :  { %v940_v63 = vpop.eup %939  ;;  %761 = vst [vmem:[#allocation2 + $0x158] sm:$0xff] %v711_v60 }
 0x142   :  { %v942_v1 = vpop.eup %941  ;;  %v712_v2 = vmul.f32 %v940_v63, %v386_v46 }
 0x143   :  { %v713_v3 = vmul.f32 %v942_v1, %v388_v48 }
 0x144   :  { %762 = vst [vmem:[#allocation2 + $0x160] sm:$0xff] %v712_v2 }
 0x145   :  { %v944_v4 = vpop.eup %943  ;;  %763 = vst [vmem:[#allocation2 + $0x168] sm:$0xff] %v713_v3 }
 0x146   :  { %v946_v5 = vpop.eup %945  ;;  %v714_v7 = vmul.f32 %v944_v4, %v392_v54 }
 0x147   :  { %v715_v8 = vmul.f32 %v946_v5, %v394_v56 }
 0x148   :  { %764 = vst [vmem:[#allocation2 + $0x170] sm:$0xff] %v714_v7 }
 0x149   :  { %v948_v9 = vpop.eup %947  ;;  %765 = vst [vmem:[#allocation2 + $0x178] sm:$0xff] %v715_v8 }
 0x14a   :  { %v950_v10 = vpop.eup %949  ;;  %v716_v11 = vmul.f32 %v948_v9, %v398_v62 }
 0x14b   :  { %v717_v12 = vmul.f32 %v950_v10, %v400_v0 }
 0x14c   :  { %766 = vst [vmem:[#allocation2 + $0x180] sm:$0xff] %v716_v11 }
 0x14d   :  { %767 = vst [vmem:[#allocation2 + $0x188] sm:$0xff] %v717_v12 }
 0x14e   :  { %962 = shalt.err (!%p959_p4)
}
 0x14f   :  { %s963_s29 = scalar_lea.hbm %s1249_s2, 6400 }
 0x150   :  { %p964_p5 = scmp.ne.s32.totalorder %s1249_s2, %s963_s29  ;;  %p967_p6 = scmp.lt.u32.totalorder %s963_s29, %s1249_s2 }
 0x152   :  { %p969_p7 = pnand %p967_p6, %p964_p5 }
 0x154   :  { %972 = shalt.err (!%p969_p7)
}
 0x155   :  { %s978_s6 = smov 256   ;;  %s979_s7 = smov 16  }
 0x156   :  { %779 = dma.vmem_to_hbm [thread:$0]  %s774_s25, 6400, %s1249_s2, [#allocation3], %s978_s6, %s978_s6, %s979_s7  }
 0x157   :  { %973 = dma.done.wait [#allocation3], 6400  }
 0x158   :  { %974 = vsyncadd [#allocation3], 4294960896 }
 0x159   :  { %783 = vsyncpa [#allocation3], 1 }

</bundles_post_ra>
